<compile_context>
chip_gen: v7x
topology: tpu7x:2x2x1
jax: 0.10.0
libtpu: 0.0.40
codegen_flags: <defaults>
</compile_context>

<pallas_src>
import functools

import jax
import jax.numpy as jnp
from jax import lax
from jax.experimental import pallas as pl
from jax.experimental.pallas import tpu as pltpu

_BN_EPS = 1e-3  # matches nn.BatchNorm2d(..., eps=0.001)


# --------------------------------------------------------------------------------------
# VMEM budgeting
# --------------------------------------------------------------------------------------
def _vmem_capacity_bytes():
    try:
        return int(pltpu.get_tpu_info().vmem_capacity_bytes)
    except Exception:
        return 64 * 1024 * 1024  # conservative fallback (v7x-sized)


_VMEM_CAP = _vmem_capacity_bytes()
_VMEM_LIMIT = int(_VMEM_CAP * 0.85)   # scoped-VMEM limit handed to Mosaic
_TILE_BUDGET = int(_VMEM_CAP * 0.40)  # per-grid-step working-set target (leaves pipelining headroom)


def _pick_hw_tile(hw, per_col_bytes, fixed_bytes, budget):
    """Largest 128-multiple divisor of hw whose per-step footprint fits the budget."""
    if hw % 128 != 0:
        # TODO(synk): HW not lane-aligned; fall back to a single full block (masked stores).
        return hw
    max_cols = (budget - fixed_bytes) // max(per_col_bytes, 1)
    if hw <= max_cols:
        return hw
    start = max(128, min(hw, (max_cols // 128) * 128))
    for t in range(start, 127, -128):
        if hw % t == 0:
            return t
    return hw


def _pick_chunk(hw, w_img, c, dsize, budget, resident_bytes):
    """Row-aligned in-kernel spatial chunk for the fused bottleneck (bounds im2col scratch)."""
    # per spatial column of a chunk: im2col patch + f32 conv result/activation + halo window + residual staging
    per_col = 9 * c * dsize + 3 * c * 4 + c * dsize
    avail = max(budget - resident_bytes, per_col * w_img)
    chunk = int(avail // per_col)
    chunk = max(w_img, (chunk // w_img) * w_img)
    # keep the static unroll shallow (<= 16 chunks)
    min_chunk = -(-hw // 16)
    min_chunk = ((min_chunk + w_img - 1) // w_img) * w_img
    chunk = max(chunk, min_chunk)
    return min(chunk, hw)


# --------------------------------------------------------------------------------------
# Kernels
# --------------------------------------------------------------------------------------
def _silu(z):
    # z is f32; reciprocal runs on the EUP (off the VALU critical path).
    return z * pl.reciprocal(1.0 + jnp.exp(-z), approx=False)


def _cv12_kernel(x_ref, w_ref, b_ref, a_ref, bb_ref, *, c_):
    # Fused cv1 + cv2: one read of x, stacked (2c_, Cin) weight, split SiLU outputs.
    xb = x_ref[...].astype(w_ref.dtype)
    z = jnp.dot(w_ref[...], xb, preferred_element_type=jnp.float32) + b_ref[...]
    y = _silu(z)
    a_ref[...] = y[:c_].astype(a_ref.dtype)
    bb_ref[...] = y[c_:].astype(bb_ref.dtype)


def _concat_cv3_kernel(a_ref, b_ref, w_ref, bias_ref, o_ref):
    # cv3(cat(a, b)) == silu(W @ [a; b] + bias); the concat lives only in VMEM.
    cat = jnp.concatenate([a_ref[...], b_ref[...]], axis=0)
    z = jnp.dot(w_ref[...], cat, preferred_element_type=jnp.float32) + bias_ref[...]
    o_ref[...] = _silu(z).astype(o_ref.dtype)


def _bottleneck_kernel(a_ref, w1_ref, b1_ref, w9_ref, b3_ref, m_ref, o_ref, *, H, W, add, chunk):
    """Fused Bottleneck: h = silu(W1 @ a); y = silu(W9 @ im2col(h)); out = y (+ a).

    All offsets are static Python ints, so row-aligned spatial chunks (with a +/-W halo taken
    from the in-VMEM `a` block) bound the im2col scratch without dynamic slicing.
    """
    HW = H * W
    w1 = w1_ref[...]
    w9 = w9_ref[...]
    b1 = b1_ref[...]
    b3 = b3_ref[...]
    n_chunks = -(-HW // chunk)
    for ci in range(n_chunks):
        s0 = ci * chunk
        s1 = min(HW, s0 + chunk)
        cl = s1 - s0
        ws = max(0, s0 - W)          # window start (one halo row above)
        we = min(HW, s1 + W)         # window end   (one halo row below)
        L = we - ws
        c0 = s0 - ws                 # offset of the output rows inside the window

        a_win = a_ref[:, ws:we]                                          # (c_, L)
        h = _silu(jnp.dot(w1, a_win, preferred_element_type=jnp.float32) + b1)
        h = h.astype(a_win.dtype)                                        # compute dtype

        cols = []
        for t in range(9):
            oy, ox = t // 3 - 1, t % 3 - 1
            d = oy * W + ox
            shift = c0 + d
            col = pltpu.roll(h, (-shift) % L, 1) if shift % L != 0 else h
            col = col[:, :cl]
            col = col * m_ref[t, :, s0:s1]       # zero out-of-image taps (wraps are always masked)
            cols.append(col)
        patch = jnp.concatenate(cols, axis=0)    # (9*c_, cl) im2col patch

        z = jnp.dot(w9, patch, preferred_element_type=jnp.float32) + b3
        y = _silu(z)
        if add:
            y = y + a_ref[:, s0:s1].astype(jnp.float32)
        o_ref[:, s0:s1] = y.astype(o_ref.dtype)


# --------------------------------------------------------------------------------------
# pallas_call wrappers
# --------------------------------------------------------------------------------------
def fused_cv1_cv2(x, w, b, c_):
    """a, b = split(silu(W_stacked @ x + bias)); x read from HBM once."""
    N, Cin, HW = map(int, x.shape)
    c2x = int(w.shape[0])  # = 2 * c_
    dt = w.dtype
    ds_in = int(x.dtype.itemsize)
    ds_out = int(jnp.dtype(dt).itemsize)
    per_col = 2 * Cin * ds_in + 2 * c2x * ds_out
    fixed = c2x * Cin * ds_out + c2x * 4
    hwt = _pick_hw_tile(HW, per_col, fixed, _TILE_BUDGET)
    cost = pl.CostEstimate(
        flops=2 * N * c2x * Cin * HW + 6 * N * c2x * HW,
        transcendentals=N * c2x * HW,
        bytes_accessed=N * Cin * HW * ds_in + N * c2x * HW * ds_out + c2x * Cin * ds_out)
    return pl.pallas_call(
        functools.partial(_cv12_kernel, c_=c_),
        out_shape=(jax.ShapeDtypeStruct((N, c_, HW), dt),
                   jax.ShapeDtypeStruct((N, c_, HW), dt)),
        grid=(N, HW // hwt),
        in_specs=[
            pl.BlockSpec((None, Cin, hwt), lambda n, s: (n, 0, s)),
            pl.BlockSpec((c2x, Cin), lambda n, s: (0, 0)),
            pl.BlockSpec((c2x, 1), lambda n, s: (0, 0)),
        ],
        out_specs=(pl.BlockSpec((None, c_, hwt), lambda n, s: (n, 0, s)),
                   pl.BlockSpec((None, c_, hwt), lambda n, s: (n, 0, s))),
        compiler_params=pltpu.CompilerParams(
            dimension_semantics=("parallel", "parallel"),
            vmem_limit_bytes=_VMEM_LIMIT),
        cost_estimate=cost,
    )(x, w, b)


def bottleneck_fused(a, w1, b1, w9, b3, masks, H, W, shortcut):
    """Fused Bottleneck(c_, c_, shortcut, e=1.0): 1x1 + 3x3 (im2col) + residual, one kernel."""
    N, c, HW = map(int, a.shape)
    dt = a.dtype
    ds = int(jnp.dtype(dt).itemsize)
    resident = 2 * (2 * c * HW * ds) + (c * c + 9 * c * c) * ds + 2 * c * 4 + 9 * HW * ds
    chunk = _pick_chunk(HW, W, c, ds, _TILE_BUDGET, resident)
    cost = pl.CostEstimate(
        flops=2 * N * c * c * HW + 18 * N * c * c * HW + 12 * N * c * HW,
        transcendentals=2 * N * c * HW,
        bytes_accessed=2 * N * c * HW * ds + 10 * c * c * ds + 9 * HW * ds)
    return pl.pallas_call(
        functools.partial(_bottleneck_kernel, H=H, W=W, add=shortcut, chunk=chunk),
        out_shape=jax.ShapeDtypeStruct((N, c, HW), dt),
        grid=(N,),
        in_specs=[
            pl.BlockSpec((None, c, HW), lambda n: (n, 0, 0)),
            pl.BlockSpec((c, c), lambda n: (0, 0)),
            pl.BlockSpec((c, 1), lambda n: (0, 0)),
            pl.BlockSpec((c, 9 * c), lambda n: (0, 0)),
            pl.BlockSpec((c, 1), lambda n: (0, 0)),
            pl.BlockSpec((9, 1, HW), lambda n: (0, 0, 0)),
        ],
        out_specs=pl.BlockSpec((None, c, HW), lambda n: (n, 0, 0)),
        compiler_params=pltpu.CompilerParams(
            dimension_semantics=("parallel",),
            vmem_limit_bytes=_VMEM_LIMIT),
        cost_estimate=cost,
    )(a, w1, b1, w9, b3, masks)


def concat_cv3(a, b, w, bias, out_dtype):
    """silu(W @ cat(a, b) + bias): cv3 over the channel concat, concat never hits HBM."""
    N, c, HW = map(int, a.shape)
    c2 = int(w.shape[0])
    ds = int(a.dtype.itemsize)
    dso = int(jnp.dtype(out_dtype).itemsize)
    per_col = 2 * (2 * c * ds) + 2 * c2 * dso
    fixed = c2 * 2 * c * ds + c2 * 4
    hwt = _pick_hw_tile(HW, per_col, fixed, _TILE_BUDGET)
    cost = pl.CostEstimate(
        flops=4 * N * c2 * c * HW + 6 * N * c2 * HW,
        transcendentals=N * c2 * HW,
        bytes_accessed=2 * N * c * HW * ds + N * c2 * HW * dso + 2 * c2 * c * ds)
    return pl.pallas_call(
        _concat_cv3_kernel,
        out_shape=jax.ShapeDtypeStruct((N, c2, HW), out_dtype),
        grid=(N, HW // hwt),
        in_specs=[
            pl.BlockSpec((None, c, hwt), lambda n, s: (n, 0, s)),
            pl.BlockSpec((None, c, hwt), lambda n, s: (n, 0, s)),
            pl.BlockSpec((c2, 2 * c), lambda n, s: (0, 0)),
            pl.BlockSpec((c2, 1), lambda n, s: (0, 0)),
        ],
        out_specs=pl.BlockSpec((None, c2, hwt), lambda n, s: (n, 0, s)),
        compiler_params=pltpu.CompilerParams(
            dimension_semantics=("parallel", "parallel"),
            vmem_limit_bytes=_VMEM_LIMIT),
        cost_estimate=cost,
    )(a, b, w, bias)


# --------------------------------------------------------------------------------------
# Parameters / module
# --------------------------------------------------------------------------------------
def _init_conv_bn(key, cin, cout, k):
    kw, kg, kb, km, kv = jax.random.split(key, 5)
    w = jax.random.normal(kw, (cout, cin, k, k), jnp.float32) / jnp.sqrt(cin * k * k)
    return dict(
        w=w,
        gamma=1.0 + 0.1 * jax.random.normal(kg, (cout,), jnp.float32),
        beta=0.1 * jax.random.normal(kb, (cout,), jnp.float32),
        mean=0.1 * jax.random.normal(km, (cout,), jnp.float32),
        var=jnp.abs(1.0 + 0.1 * jax.random.normal(kv, (cout,), jnp.float32)),
    )


def _fold_bn(p, dtype):
    """Fold inference-mode BatchNorm into the conv weight/bias; weight cast to compute dtype."""
    s = p["gamma"] / jnp.sqrt(p["var"] + _BN_EPS)
    w = p["w"] * s[:, None, None, None]
    bias = (p["beta"] - p["mean"] * s).reshape(-1, 1)                      # f32
    cout, cin, kh, kw = p["w"].shape
    if kh == 1:
        return w[:, :, 0, 0].astype(dtype), bias                          # (Cout, Cin)
    # im2col layout: columns ordered tap-major (ky, kx), then input channel.
    return jnp.transpose(w, (0, 2, 3, 1)).reshape(cout, kh * kw * cin).astype(dtype), bias


def _tap_masks(H, W, dtype):
    """(9, 1, H*W) validity mask per 3x3 tap (zero-padding borders of the SAME conv)."""
    HW = H * W
    pos = jnp.arange(HW, dtype=jnp.int32)
    row, col = pos // W, pos % W
    m = []
    for t in range(9):
        oy, ox = t // 3 - 1, t % 3 - 1
        m.append((row + oy >= 0) & (row + oy < H) & (col + ox >= 0) & (col + ox < W))
    return jnp.stack(m).astype(dtype).reshape(9, 1, HW)


class C3:
    """JAX/Pallas equivalent of the PyTorch C3 module (inference-mode BatchNorm)."""

    def __init__(self, c1, c2, n=1, shortcut=True, g=1, e=0.5, *, key,
                 compute_dtype=jnp.bfloat16):
        # TODO(synk): grouped 3x3 conv (g != 1) not implemented; C3's default is g=1.
        assert g == 1, "only g=1 (the default) is supported"
        c_ = int(c2 * e)
        self.c1, self.c2, self.c_ = c1, c2, c_
        self.n, self.shortcut = n, shortcut
        self.compute_dtype = compute_dtype
        keys = jax.random.split(key, 3 + 2 * n)
        self.cv1 = _init_conv_bn(keys[0], c1, c_, 1)
        self.cv2 = _init_conv_bn(keys[1], c1, c_, 1)
        self.cv3 = _init_conv_bn(keys[2], 2 * c_, c2, 1)
        self.m = [(_init_conv_bn(keys[3 + 2 * i], c_, c_, 1),
                   _init_conv_bn(keys[4 + 2 * i], c_, c_, 3)) for i in range(n)]
        # BN-folded, kernel-ready parameters (compute-dtype weights, f32 biases).
        w1f, b1f = _fold_bn(self.cv1, compute_dtype)
        w2f, b2f = _fold_bn(self.cv2, compute_dtype)
        self._cv12_w = jnp.concatenate([w1f, w2f], axis=0)        # (2c_, c1)
        self._cv12_b = jnp.concatenate([b1f, b2f], axis=0)        # (2c_, 1)
        self._cv3 = _fold_bn(self.cv3, compute_dtype)             # (c2, 2c_), (c2, 1)
        self._m = [(_fold_bn(p1, compute_dtype), _fold_bn(p2, compute_dtype))
                   for p1, p2 in self.m]

    def __call__(self, x):
        N, C1, H, W = map(int, x.shape)
        assert C1 == self.c1
        HW = H * W
        xf = x.reshape(N, C1, HW)                         # lane-dense layout: last dim = H*W
        a, b = fused_cv1_cv2(xf, self._cv12_w, self._cv12_b, self.c_)
        masks = _tap_masks(H, W, self.compute_dtype)
        for (w1, b1), (w9, b3) in self._m:                # Bottleneck(c_, c_, shortcut, e=1.0)
            a = bottleneck_fused(a, w1, b1, w9, b3, masks, H, W, self.shortcut)
        w3, bias3 = self._cv3
        out = concat_cv3(a, b, w3, bias3, x.dtype)        # fused concat + cv3
        return out.reshape(N, self.c2, H, W)

    # Pure-JAX/XLA f32 reference, used only for correctness checking.
    def reference(self, x):
        def cbs(x, p, pad):
            y = lax.conv_general_dilated(
                x, p["w"], (1, 1), [(pad, pad), (pad, pad)],
                dimension_numbers=("NCHW", "OIHW", "NCHW"),
                precision=lax.Precision.HIGHEST)
            s = p["gamma"] / jnp.sqrt(p["var"] + _BN_EPS)
            y = y * s[None, :, None, None] + (p["beta"] - p["mean"] * s)[None, :, None, None]
            return y / (1.0 + jnp.exp(-y))
        a = cbs(x, self.cv1, 0)
        b = cbs(x, self.cv2, 0)
        for p1, p2 in self.m:
            t = cbs(cbs(a, p1, 0), p2, 1)
            a = a + t if self.shortcut else t
        return cbs(jnp.concatenate([a, b], axis=1), self.cv3, 0)


if __name__ == "__main__":
    key = jax.random.PRNGKey(0)
    k_mod, k_x = jax.random.split(key)

    # Small NCHW feature map: batch=2, c1=16 -> c2=32, 16x16 spatial, n=1 bottleneck.
    c1, c2 = 16, 32
    x = jax.random.normal(k_x, (2, c1, 16, 16), dtype=jnp.float32)

    # Exact f32 path: validates the fused/im2col kernel algorithm against the XLA reference.
    m32 = C3(c1, c2, n=1, shortcut=True, key=k_mod, compute_dtype=jnp.float32)
    out32 = jax.block_until_ready(m32(x))
    ref = jax.block_until_ready(m32.reference(x))
    assert out32.shape == ref.shape, (out32.shape, ref.shape)
    err32 = float(jnp.max(jnp.abs(out32 - ref)))
    assert jnp.allclose(out32, ref, atol=2e-3, rtol=2e-3), f"f32 max abs err {err32}"

    # Default bf16 perf path (per perf review): bf16 matmul operands / intermediates with f32
    # accumulation; tolerance sized for ~2^-9 input quantization through K<=144 dot chains.
    m16 = C3(c1, c2, n=1, shortcut=True, key=k_mod)
    out16 = jax.block_until_ready(m16(x))
    err16 = float(jnp.max(jnp.abs(out16 - ref)))
    assert jnp.allclose(out16, ref, atol=8e-2, rtol=8e-2), f"bf16 max abs err {err16}"

    print("KERNEL_OK")
</pallas_src>

<mosaic_0001>
module attributes {stable_mosaic.version = 11 : i64} {
  func.func @_cv12_kernel(%arg0: i32, %arg1: i32, %arg2: memref<1x16x256xf32, #tpu.memory_space<vmem>>, %arg3: memref<32x16xf32, #tpu.memory_space<vmem>>, %arg4: memref<32x1xf32, #tpu.memory_space<vmem>>, %arg5: memref<1x16x256xf32, #tpu.memory_space<vmem>>, %arg6: memref<1x16x256xf32, #tpu.memory_space<vmem>>) attributes {dimension_semantics = [#tpu.dimension_semantics<parallel>, #tpu.dimension_semantics<parallel>], iteration_bounds = array<i64: 2, 1>, scalar_prefetch = 0 : i64, scratch_operands = 0 : i64, tpu.core_type = #tpu.core_type<tc>, window_params = [{transform_indices = @transform_0, window_bounds = array<i64: 1, 16, 256>}, {pipeline_mode = #tpu.pipeline_mode<synchronous>, transform_indices = @transform_1, window_bounds = array<i64: 32, 16>}, {pipeline_mode = #tpu.pipeline_mode<synchronous>, transform_indices = @transform_2, window_bounds = array<i64: 32, 1>}, {transform_indices = @transform_3, window_bounds = array<i64: 1, 16, 256>}, {transform_indices = @transform_4, window_bounds = array<i64: 1, 16, 256>}]} {
    %c0 = arith.constant 0 : index
    %c0_0 = arith.constant 0 : index
    %c0_1 = arith.constant 0 : index
    %0 = vector.load %arg2[%c0, %c0_0, %c0_1] : memref<1x16x256xf32, #tpu.memory_space<vmem>>, vector<1x16x256xf32>
    %1 = vector.shape_cast %0 : vector<1x16x256xf32> to vector<16x256xf32>
    %c0_2 = arith.constant 0 : index
    %c0_3 = arith.constant 0 : index
    %2 = vector.load %arg3[%c0_2, %c0_3] : memref<32x16xf32, #tpu.memory_space<vmem>>, vector<32x16xf32>
    %cst = arith.constant dense<0.000000e+00> : vector<32x256xf32>
    %3 = tpu.matmul %2, %1, %cst {dimension_numbers = #tpu.dot_dimension_numbers<[1], [0], [0], [1], [0, 0, 1, 1], [], []>} : vector<32x16xf32>, vector<16x256xf32>, vector<32x256xf32> -> vector<32x256xf32>
    %c0_4 = arith.constant 0 : index
    %c0_5 = arith.constant 0 : index
    %4 = vector.load %arg4[%c0_4, %c0_5] : memref<32x1xf32, #tpu.memory_space<vmem>>, vector<32x1xf32>
    %5 = vector.broadcast %4 : vector<32x1xf32> to vector<32x256xf32>
    %6 = arith.addf %3, %5 : vector<32x256xf32>
    %cst_6 = arith.constant 0.000000e+00 : f32
    %7 = vector.broadcast %cst_6 : f32 to vector<32x256xf32>
    %8 = arith.subf %7, %6 : vector<32x256xf32>
    %9 = math.exp %8 : vector<32x256xf32>
    %cst_7 = arith.constant 1.000000e+00 : f32
    %10 = vector.broadcast %cst_7 : f32 to vector<32x256xf32>
    %11 = arith.addf %10, %9 : vector<32x256xf32>
    %12 = tpu.reciprocal %11 : vector<32x256xf32> -> vector<32x256xf32>
    %13 = arith.mulf %6, %12 : vector<32x256xf32>
    %14 = vector.extract_strided_slice %13 {offsets = [0, 0], sizes = [16, 256], strides = [1, 1]} : vector<32x256xf32> to vector<16x256xf32>
    %c0_8 = arith.constant 0 : index
    %c0_9 = arith.constant 0 : index
    %c0_10 = arith.constant 0 : index
    %15 = vector.load %arg5[%c0_8, %c0_9, %c0_10] : memref<1x16x256xf32, #tpu.memory_space<vmem>>, vector<1x16x256xf32>
    %16 = vector.shape_cast %15 : vector<1x16x256xf32> to vector<16x256xf32>
    %17 = vector.shape_cast %14 : vector<16x256xf32> to vector<1x16x256xf32>
    tpu.vector_store %arg5[%c0_8, %c0_9, %c0_10], %17 {strides = array<i32>} : memref<1x16x256xf32, #tpu.memory_space<vmem>>, vector<1x16x256xf32>,
    %18 = vector.extract_strided_slice %13 {offsets = [16, 0], sizes = [16, 256], strides = [1, 1]} : vector<32x256xf32> to vector<16x256xf32>
    %c0_11 = arith.constant 0 : index
    %c0_12 = arith.constant 0 : index
    %c0_13 = arith.constant 0 : index
    %19 = vector.load %arg6[%c0_11, %c0_12, %c0_13] : memref<1x16x256xf32, #tpu.memory_space<vmem>>, vector<1x16x256xf32>
    %20 = vector.shape_cast %19 : vector<1x16x256xf32> to vector<16x256xf32>
    %21 = vector.shape_cast %18 : vector<16x256xf32> to vector<1x16x256xf32>
    tpu.vector_store %arg6[%c0_11, %c0_12, %c0_13], %21 {strides = array<i32>} : memref<1x16x256xf32, #tpu.memory_space<vmem>>, vector<1x16x256xf32>,
    return
  }
  func.func @transform_0(%arg0: i32, %arg1: i32) -> (i32, i32, i32) {
    %c0_i32 = arith.constant 0 : i32
    %c0_i32_0 = arith.constant 0 : i32
    return %arg0, %c0_i32, %arg1 : i32, i32, i32
  }
  func.func @transform_1(%arg0: i32, %arg1: i32) -> (i32, i32) {
    %c0_i32 = arith.constant 0 : i32
    %c0_i32_0 = arith.constant 0 : i32
    %c0_i32_1 = arith.constant 0 : i32
    return %c0_i32, %c0_i32_0 : i32, i32
  }
  func.func @transform_2(%arg0: i32, %arg1: i32) -> (i32, i32) {
    %c0_i32 = arith.constant 0 : i32
    %c0_i32_0 = arith.constant 0 : i32
    %c0_i32_1 = arith.constant 0 : i32
    return %c0_i32, %c0_i32_0 : i32, i32
  }
  func.func @transform_3(%arg0: i32, %arg1: i32) -> (i32, i32, i32) {
    %c0_i32 = arith.constant 0 : i32
    %c0_i32_0 = arith.constant 0 : i32
    return %arg0, %c0_i32, %arg1 : i32, i32, i32
  }
  func.func @transform_4(%arg0: i32, %arg1: i32) -> (i32, i32, i32) {
    %c0_i32 = arith.constant 0 : i32
    %c0_i32_0 = arith.constant 0 : i32
    return %arg0, %c0_i32, %arg1 : i32, i32, i32
  }
}

</mosaic_0001>

<bundles_post_ra>
// kernel: tpu_custom_call.1
= control target key start
LH: loop header
LB: loop body
LE: loop exit
PB: predicated region body
PF: predicated region fallthrough
CT: control target
= control target key end

     0   :  { %10 = vsyncpa [#allocation3], 0  ;;  %s1066_s0 = inlined_call_operand.vmem [shape: f32[2,16,256], index: 0, kind: input, shape index: {}]   ;;  %s1067_s1 = inlined_call_operand.vmem [shape: f32[32,16], index: 1, kind: input, shape index: {}]   ;;  %s1068_s2 = inlined_call_operand.vmem [shape: f32[32,1], index: 2, kind: input, shape index: {}]   ;;  %s1069_s3 = inlined_call_operand.hbm [shape: f32[2,16,256], index: 3, kind: output, shape index: {0}]   ;;  %s1070_s4 = inlined_call_operand.hbm [shape: f32[2,16,256], index: 4, kind: output, shape index: {1}]  }
   0x1   :  { %12 = vsyncpa [#allocation3 + $0x1], 0 }
   0x2   :  { %13 = vsyncpa [#allocation5], 0 }
   0x3   :  { %15 = vsyncpa [#allocation5 + $0x1], 0  ;;  %s855_s15 = smov 0   ;;  %s857_s16 = smov 0  }
   0x4   :  { %s859_s17 = smov 0   ;;  %s861_s18 = smov 0  }
   0x5   :  { %s863_s19 = smov 0   ;;  %s865_s20 = smov 0  }
   0x6 LB: > { %s584_s21 = sadd.s32 4294967295, %s822_s20   ;;  %s585_s22 = sadd.s32 4294967294, %s822_s20   ;;  %s822_s20 = sphi %s865_s20, %s21_s20   ;;  %s818_s19 = sphi %s863_s19, %s1077_s19   ;;  %s814_s18 = sphi %s861_s18, %s1076_s18   ;;  %s810_s17 = sphi %s859_s17, %s1075_s17   ;;  %s806_s16 = sphi %s857_s16, %s1074_s16   ;;  %s802_s15 = sphi %s855_s15, %s1073_s15  }
   0x7   : > { %s33_s23 = sadd.s32 1, %s818_s19  ;;  %s112_s24 = sadd.s32 1, %s810_s17 }
   0x8   : > { %p35_p0 = scmp.ge.s32.totalorder %s33_s23, 2  ;;  %p122_p1 = scmp.ne.s32.totalorder %s810_s17, %s806_s16 }
   0x9   : > { %p123_p2 = scmp.eq.s32.totalorder %s584_s21, 1  ;;  %p128_p3 = scmp.ne.s32.totalorder %s806_s16, %s802_s15 }
   0xa   : > { %s1079_s23 = smov (%p35_p0, %s33_s23), 0  ;;  %p129_p5 = scmp.eq.s32.totalorder %s585_s22, 1 }
   0xb   : > { %p895_p4 = por %p123_p2, %p122_p1  ;;  %s107_s26 = ssub.s32 %s818_s19, %s1079_s23 }
   0xc   : > { %p588_p6 = scmp.ge.s32.totalorder %s822_s20, 1  ;;  %p110_p7 = scmp.eq.s32.totalorder %s107_s26, 0 }
   0xd   : > { %p902_p8 = por %p129_p5, %p128_p3  ;;  %p194_p9 = scmp.lt.s32.totalorder %s822_s20, 3 }
   0xe   : > { %s908_s28 = scalar_select %p110_p7, %s810_s17, %s112_s24  }
   0xf   : > { %p195_p10 = pnand %p588_p6, %p194_p9 }
  0x10   : > { %p230_p11 = scmp.lt.s32.totalorder (!%p195_p10), %s814_s18, 1  ;;  %v824_v0 = vmov (!%p195_p10), 0.0   ;;  %v251_v1 = vld [vmem:[%s1068_s2 + $0x10] sm:$0xff] (!%p195_p10)  ;;  %v249_v2 = vld [vmem:[%s1068_s2] sm:$0xff] (!%p195_p10)  ;;  %v825_v3 = vmov (!%p195_p10), 0   ;;  %v252_v4 = vld [vmem:[%s1068_s2 + $0x18] sm:$0xff] (!%p195_p10) }
  0x11   : > { %198 = sbr.rel (%p195_p10) target bundleno = 324 (0x144), region = 32  ;;  %350 = vmatprep.mubr.f32.mxu0 (!%p195_p10), %v824_v0  ;;  %362 = vmatprep.mubr.f32.mxu1 (!%p195_p10), %v824_v0  ;;  %v250_v5 = vld [vmem:[%s1068_s2 + $0x8] sm:$0xff] (!%p195_p10)  ;;  %v245_v12 = vld [vmem:[%s1067_s1] sm:$0xff] (!%p195_p10)  ;;  %vm273_vm0 = vcmask (!%p195_p10), 130048   ;;  %v247_v13 = vld [vmem:[%s1067_s1 + $0x10] sm:$0xff] (!%p195_p10)  ;;  %s606_s12 = sshll.u32 (!%p195_p10), %s814_s18, 9 }
  0x12   : > { %679 = vset.pattern.permute.xlu1 (!%p195_p10), %v825_v3  ;;  %678 = vset.pattern.permute.xlu0 (!%p195_p10), %v825_v3  ;;  %v246_v14 = vld [vmem:[%s1067_s1 + $0x8] sm:$0xff] (!%p195_p10)  ;;  %v248_v15 = vld [vmem:[%s1067_s1 + $0x18] sm:$0xff] (!%p195_p10)  ;;  %s979_s22 = scalar_lea.hbm (!%p195_p10), %s1069_s3, %s606_s12  ;;  %s988_s29 = scalar_lea.hbm (!%p195_p10), %s1070_s4, %s606_s12 }
  0x13   : > { %265 = vperm.xlu1 (!%p195_p10), %679, %v251_v1   ;;  %255 = vperm.xlu0 (!%p195_p10), %678, %v249_v2   ;;  %s826_s6 = smov (!%p195_p10), [#allocation2]  }
  0x17   : > { %270 = vperm.xlu1 (!%p195_p10), %679, %v252_v4   ;;  %260 = vperm.xlu0 (!%p195_p10), %678, %v250_v5  }
  0x18   : > { %s231_s7 = scalar_select %p230_p11, %s814_s18, 1 }
  0x1a   : > { %s605_s8 = sshll.u32 %s231_s7, 5  ;;  %s716_s7 = sshll.u32 %s826_s6, 4  ;;  %s717_s7 = int_to_ptr.vmem [resolvable:$false] %s716_s7 }
  0x1b   : > { %s237_s21 = scalar_lea.vmem %s1066_s0, %s605_s8  ;;  %s964_s8 = sand.u32 1, %s806_s16  }
  0x1c   : > { %v242_v6 = vld [vmem:[%s237_s21 + $0x8] sm:$0xff]  ;;  %v244_v7 = vld [vmem:[%s237_s21 + $0x18] sm:$0xff]  ;;  %v241_v8 = vld [vmem:[%s237_s21] sm:$0xff]  ;;  %s589_s9 = sshll.u32 %s964_s8, 5  ;;  %s432_s30 = scalar_lea.sflag [#allocation3], %s964_s8 }
  0x1d   : > { %v608_v9 = vpack.c.bf16 %v244_v7, %v242_v6  ;;  %v243_v10 = vld [vmem:[%s237_s21 + $0x10] sm:$0xff]  ;;  %s221_s10 = scalar_lea.vmem [#allocation2], %s589_s9  ;;  %s228_s13 = scalar_lea.vmem [#allocation4], %s589_s9 }
  0x1e   : > { %v610_v11 = vpack.c.bf16 %v243_v10, %v241_v8  ;;  %s452_s11 = sshll.u32 %s221_s10, 4  ;;  %s470_s14 = sshll.u32 %s228_s13, 4  ;;  %s973_s11 = int_to_ptr.vmem [resolvable:$true] %s452_s11  ;;  %s982_s14 = int_to_ptr.vmem [resolvable:$true] %s470_s14 }
  0x1f   : > { %609 = vmatprep.subr.bf16.mxu0 %v608_v9  ;;  %612 = vmatprep.subr.bf16.mxu1 %v608_v9  ;;  %s712_s5 = scalar_lea.vmem %s973_s11, 512  ;;  %s718_s9 = scalar_lea.vmem %s717_s7, 1024 }
  0x20   : > { %611 = vmatpush1.bf16.msra.mxu0 %v610_v11  ;;  %613 = vmatpush1.bf16.msra.mxu1 %v610_v11  ;;  %p713_p12 = scmp.ne.s32.totalorder %s973_s11, %s712_s5  ;;  %p719_p1 = scmp.lt.s32.totalorder %s973_s11, %s717_s7 }
  0x21   : > { %p720_p2 = scmp.lt.s32.totalorder %s718_s9, %s712_s5 }
  0x22   : > { %p714_p13 = pnand %p713_p12, %p895_p4 }
  0x23   : > { %593 = vmatmul.mubr.msk.f32.vlgmr.msra.gmra.mrb[0].mxu0 %vm273_vm0, %v245_v12  ;;  %595 = vmatmul.mubr.msk.f32.vlgmr.msra.gmra.mrb[0].mxu1 %vm273_vm0, %v247_v13  ;;  %p721_p3 = por %p720_p2, %p719_p1 }
  0x24   : > { %356 = vmatprep.mubr.f32.mxu0 %v824_v0  ;;  %368 = vmatprep.mubr.f32.mxu1 %v824_v0  ;;  %p715_p0 = pneg %p714_p13 }
  0x26   : > { %p722_p5 = pnand %p721_p3, %p715_p0 }
  0x27   : > { %594 = vmatmul.mubr.msk.f32.gmra.mrb[2].mxu0 %vm273_vm0, %v246_v14  ;;  %596 = vmatmul.mubr.msk.f32.gmra.mrb[2].mxu1 %vm273_vm0, %v248_v15 }
  0x92   : > { %v266_v16 = vpop.permute.xlu1 %265  ;;  %v256_v17 = vpop.permute.xlu0 %255 }
  0x96   : > { %v271_v28 = vpop.permute.xlu1 %270  ;;  %v261_v29 = vpop.permute.xlu0 %260 }
  0xf6   : > { %v352_v18 = vpop.f32.mrb[0].mxu0  ;;  %v364_v19 = vpop.f32.mrb[0].mxu1 }
  0xf7   : > { %v939_v20 = vadd.f32 %v352_v18, %v256_v17  ;;  %v941_v21 = vadd.f32 %v364_v19, %v266_v16  ;;  %v354_v22 = vpop.f32.mrb[1].mxu0  ;;  %v366_v23 = vpop.f32.mrb[1].mxu1 }
  0xf8   : > { %v943_v24 = vadd.f32 %v354_v22, %v256_v17  ;;  %v945_v25 = vadd.f32 %v366_v23, %v266_v16 }
  0xf9   : > { %v375_v26 = vsub.f32 0.0, %v939_v20  ;;  %v379_v27 = vsub.f32 0.0, %v941_v21 }
  0xfa   : > { %v376_v30 = vsub.f32 0.0, %v943_v24  ;;  %v380_v31 = vsub.f32 0.0, %v945_v25  ;;  %v358_v32 = vpop.f32.mrb[2].mxu0  ;;  %v370_v33 = vpop.f32.mrb[2].mxu1 }
  0xfb   : > { %v383_v34 = vmul.f32 1.442695, %v375_v26  ;;  %v391_v35 = vmul.f32 1.442695, %v379_v27  ;;  %v951_v36 = vadd.f32 %v358_v32, %v261_v29  ;;  %v953_v37 = vadd.f32 %v370_v33, %v271_v28  ;;  %v360_v38 = vpop.f32.mrb[3].mxu0  ;;  %v372_v39 = vpop.f32.mrb[3].mxu1 }
  0xfc   : > { %v385_v40 = vmul.f32 1.442695, %v376_v30  ;;  %v393_v41 = vmul.f32 1.442695, %v380_v31  ;;  %v955_v42 = vadd.f32 %v360_v38, %v261_v29  ;;  %v957_v43 = vadd.f32 %v372_v39, %v271_v28 }
  0xfd   : > { %680 = vpow2.f32 %v383_v34  ;;  %v377_v44 = vsub.f32 0.0, %v951_v36  ;;  %v381_v45 = vsub.f32 0.0, %v953_v37 }
  0xfe   : > { %682 = vpow2.f32 %v391_v35  ;;  %v378_v46 = vsub.f32 0.0, %v955_v42  ;;  %v382_v47 = vsub.f32 0.0, %v957_v43 }
  0xff   : > { %684 = vpow2.f32 %v385_v40  ;;  %v387_v48 = vmul.f32 1.442695, %v377_v44  ;;  %v395_v49 = vmul.f32 1.442695, %v381_v45 }
 0x100   : > { %686 = vpow2.f32 %v393_v41  ;;  %v389_v50 = vmul.f32 1.442695, %v378_v46  ;;  %v397_v51 = vmul.f32 1.442695, %v382_v47 }
 0x101   : > { %688 = vpow2.f32 %v387_v48 }
 0x102   : > { %690 = vpow2.f32 %v395_v49 }
 0x103   : > { %692 = vpow2.f32 %v389_v50 }
 0x104   : > { %694 = vpow2.f32 %v397_v51 }
 0x107   : > { %v681_v52 = vpop.eup %680 }
 0x108   : > { %v683_v53 = vpop.eup %682  ;;  %v399_v54 = vadd.f32 1.0, %v681_v52 }
 0x109   : > { %v685_v55 = vpop.eup %684  ;;  %v403_v56 = vadd.f32 1.0, %v683_v53 }
 0x10a   : > { %v687_v57 = vpop.eup %686  ;;  %696 = vrcp.f32 %v399_v54  ;;  %v400_v58 = vadd.f32 1.0, %v685_v55 }
 0x10b   : > { %v689_v59 = vpop.eup %688  ;;  %698 = vrcp.f32 %v403_v56  ;;  %v404_v60 = vadd.f32 1.0, %v687_v57 }
 0x10c   : > { %v691_v61 = vpop.eup %690  ;;  %700 = vrcp.f32 %v400_v58  ;;  %v401_v62 = vadd.f32 1.0, %v689_v59 }
 0x10d   : > { %v693_v63 = vpop.eup %692  ;;  %702 = vrcp.f32 %v404_v60  ;;  %v405_v0 = vadd.f32 1.0, %v691_v61 }
 0x10e   : > { %v695_v1 = vpop.eup %694  ;;  %704 = vrcp.f32 %v401_v62  ;;  %v402_v2 = vadd.f32 1.0, %v693_v63 }
 0x10f   : > { %706 = vrcp.f32 %v405_v0  ;;  %v406_v3 = vadd.f32 1.0, %v695_v1 }
 0x110   : > { %708 = vrcp.f32 %v402_v2 }
 0x111   : > { %710 = vrcp.f32 %v406_v3 }
 0x114   : > { %v697_v4 = vpop.eup %696 }
 0x115   : > { %v699_v5 = vpop.eup %698  ;;  %v415_v6 = vmul.f32 %v697_v4, %v939_v20 }
 0x116   : > { %v701_v7 = vpop.eup %700  ;;  %v419_v8 = vmul.f32 %v699_v5, %v941_v21 }
 0x117   : > { %v703_v9 = vpop.eup %702  ;;  %423 = vst [vmem:[%s221_s10] sm:$0xff] %v415_v6  ;;  %v416_v10 = vmul.f32 %v701_v7, %v943_v24 }
 0x118   : > { %v705_v11 = vpop.eup %704  ;;  %427 = vst [vmem:[%s228_s13] sm:$0xff] %v419_v8  ;;  %v420_v12 = vmul.f32 %v703_v9, %v945_v25 }
 0x119   : > { %v707_v13 = vpop.eup %706  ;;  %424 = vst [vmem:[%s221_s10 + $0x8] sm:$0xff] %v416_v10  ;;  %v417_v14 = vmul.f32 %v705_v11, %v951_v36 }
 0x11a   : > { %v709_v15 = vpop.eup %708  ;;  %428 = vst [vmem:[%s228_s13 + $0x8] sm:$0xff] %v420_v12  ;;  %v421_v16 = vmul.f32 %v707_v13, %v953_v37 }
 0x11b   : > { %v711_v17 = vpop.eup %710  ;;  %425 = vst [vmem:[%s221_s10 + $0x10] sm:$0xff] %v417_v14  ;;  %v418_v18 = vmul.f32 %v709_v15, %v955_v42 }
 0x11c   : > { %429 = vst [vmem:[%s228_s13 + $0x10] sm:$0xff] %v421_v16  ;;  %v422_v19 = vmul.f32 %v711_v17, %v957_v43 }
 0x11d   : > { %426 = vst [vmem:[%s221_s10 + $0x18] sm:$0xff] %v418_v18 }
 0x11e   : > { %430 = vst [vmem:[%s228_s13 + $0x18] sm:$0xff] %v422_v19 }
 0x11f   : > { %725 = shalt.err (!%p722_p5)
}
 0x120   : > { %s726_s10 = scalar_lea.hbm %s979_s22, 512  ;;  %s730_s18 = scalar_lea.hbm %s1069_s3, 1024 }
 0x121   : > { %p727_p6 = scmp.ne.s32.totalorder %s979_s22, %s726_s10  ;;  %p731_p10 = scmp.lt.u32.totalorder %s979_s22, %s1069_s3 }
 0x122   : > { %p732_p11 = scmp.lt.u32.totalorder %s730_s18, %s726_s10  ;;  %p734_p13 = scmp.lt.u32.totalorder %s726_s10, %s979_s22 }
 0x123   : > { %p728_p7 = pnand %p727_p6, %p895_p4 }
 0x124   : > { %p733_p12 = por %p732_p11, %p731_p10 }
 0x125   : > { %p729_p9 = pneg %p728_p7 }
 0x126   : > { %p735_p0 = por %p734_p13, %p733_p12 }
 0x128   : > { %p736_p1 = pnand %p735_p0, %p729_p9 }
 0x12a   : > { %739 = shalt.err (!%p736_p1)
}
 0x12b   : > { %s827_s26 = smov 256   ;;  %s828_s5 = smov 16  }
 0x12c   : > { %614 = dma.vmem_to_hbm [thread:$0]  (%p895_p4), %s973_s11, 512, %s979_s22, %s432_s30, %s827_s26, %s827_s26, %s828_s5  }
 0x12d   : > { %s437_s6 = scalar_lea.sflag [#allocation5], %s964_s8  ;;  %s740_s7 = scalar_lea.vmem %s982_s14, 512 }
 0x12e   : > { %p741_p2 = scmp.ne.s32.totalorder %s982_s14, %s740_s7  ;;  %s829_s9 = smov [#allocation4]  }
 0x12f   : > { %s744_s10 = sshll.u32 %s829_s9, 4  ;;  %s745_s10 = int_to_ptr.vmem [resolvable:$false] %s744_s10 }
 0x130   : > { %p742_p3 = pnand %p741_p2, %p895_p4  ;;  %s746_s12 = scalar_lea.vmem %s745_s10, 1024 }
 0x131   : > { %p747_p6 = scmp.lt.s32.totalorder %s982_s14, %s745_s10  ;;  %p748_p7 = scmp.lt.s32.totalorder %s746_s12, %s740_s7 }
 0x132   : > { %p743_p5 = pneg %p742_p3 }
 0x133   : > { %p749_p9 = por %p748_p7, %p747_p6 }
 0x135   : > { %p750_p10 = pnand %p749_p9, %p743_p5 }
 0x137   : > { %753 = shalt.err (!%p750_p10)
}
 0x138   : > { %s754_s11 = scalar_lea.hbm %s988_s29, 512  ;;  %s758_s13 = scalar_lea.hbm %s1070_s4, 1024 }
 0x139   : > { %p755_p11 = scmp.ne.s32.totalorder %s988_s29, %s754_s11  ;;  %p759_p0 = scmp.lt.u32.totalorder %s988_s29, %s1070_s4 }
 0x13a   : > { %p760_p1 = scmp.lt.u32.totalorder %s758_s13, %s754_s11  ;;  %p762_p3 = scmp.lt.u32.totalorder %s754_s11, %s988_s29 }
 0x13b   : > { %p756_p12 = pnand %p755_p11, %p895_p4 }
 0x13c   : > { %p761_p2 = por %p760_p1, %p759_p0 }
 0x13d   : > { %p757_p13 = pneg %p756_p12 }
 0x13e   : > { %p763_p5 = por %p762_p3, %p761_p2 }
 0x140   : > { %p764_p6 = pnand %p763_p5, %p757_p13 }
 0x142   : > { %767 = shalt.err (!%p764_p6)
}
 0x143   : > { %615 = dma.vmem_to_hbm [thread:$0]  (%p895_p4), %s982_s14, 512, %s988_s29, %s437_s6, %s827_s26, %s827_s26, %s828_s5  }
 0x144 PF: > { %p625_p7 = scmp.ge.s32.totalorder %s822_s20, 2  ;;  %s485_s24 = sand.u32 1, %s802_s15  }
 0x145   : > { %s486_s7 = scalar_lea.sflag [#allocation3], %s485_s24 }
 0x146   : > { %p619_p9 = pnand %p625_p7, %p902_p8 }
 0x148   : > { %793 = dma.done.wait (!%p619_p9), %s486_s7, 512  }
 0x149   : > { %795 = vsyncadd (!%p619_p9), %s486_s7, 4294966784  ;;  %s495_s25 = scalar_lea.sflag [#allocation5], %s485_s24 }
 0x14a   : > { %797 = dma.done.wait (!%p619_p9), %s495_s25, 512  }
 0x14b   : > { %799 = vsyncadd (!%p619_p9), %s495_s25, 4294966784  ;;  %s21_s20 = sadd.s32 1, %s822_s20   ;;  %s1073_s15 = smov %s806_s16 }
 0x14c   : > { %p18_p10 = scmp.ge.s32.totalorder %s21_s20, 4   ;;  %s1074_s16 = smov %s810_s17 }
 0x14d   : > { %s1075_s17 = smov %s908_s28  ;;  %s1076_s18 = smov %s818_s19 }
 0x14e   : > { %s1077_s19 = smov %s1079_s23  ;;  %20 = sbr.rel (!%p18_p10) target bundleno = 6 (0x6), region = 84 }
 0x155   :  { %500 = vsyncpa [#allocation3], 1 }
 0x156   :  { %502 = vsyncpa [#allocation3 + $0x1], 1 }
 0x157   :  { %503 = vsyncpa [#allocation5], 1 }
 0x158   :  { %505 = vsyncpa [#allocation5 + $0x1], 1 }

</bundles_post_ra>
